<compile_context>
chip_gen: v7x
topology: tpu7x:2x2x1
jax: 0.10.0
libtpu: 0.0.40
codegen_flags: <defaults>
</compile_context>

<pallas_src>
import math

import jax
import jax.numpy as jnp
from jax.experimental import pallas as pl
from jax.experimental.pallas import tpu as pltpu


_MIN_GRID_STEPS = 8            # enough steps for DMA overlap + v7x megacore split
_MIN_STEP_BYTES = 512 * 1024   # but never shard tiny inputs into sub-µs steps
_VMEM_HEADROOM = 8 * 1024 * 1024


def _layer_scale_kernel(x_ref, g_ref, o_ref):
    # x_ref: (tm, W) tile, g_ref: (1, W) resident gamma row, o_ref: (tm, W).
    # HBM-bound op: the sublane broadcast of gamma rides in VPU slack.
    o_ref[...] = (x_ref[...] * g_ref[...]).astype(o_ref.dtype)


def _cdiv(a, b):
    return (a + b - 1) // b


def _round_down(x, m):
    return (x // m) * m


def _round_up(x, m):
    return _cdiv(x, m) * m


def _sublane_align(dtype):
    # native sublane packing: f32 -> 8 rows, bf16 -> 16, int8/fp8 -> 32
    return {4: 8, 2: 16, 1: 32}.get(jnp.dtype(dtype).itemsize, 8)


def _default_vmem_limit_bytes():
    # Generation-aware limit: physical VMEM minus 16 MiB headroom, capped at
    # 96 MiB.  v7x (64 MiB/core) -> 48 MiB; v5e/v6e (128 MiB) -> 96 MiB.
    try:
        cap = pltpu.get_tpu_info().vmem_capacity_bytes
    except Exception:
        cap = 64 * 1024 * 1024  # conservative fallback (v7x per-core size)
    return int(min(96 * 1024 * 1024,
                   max(32 * 1024 * 1024, cap - 16 * 1024 * 1024)))


def _layer_scale_2d(x2, gamma_row, *, tm, row_align, vmem_limit_bytes,
                    out_dtype, donate_input):
    """Run the kernel over a 2-D view x2: (rows, W), gamma_row: (1, W)."""
    rows, W = x2.shape
    itemsize = max(jnp.dtype(x2.dtype).itemsize, jnp.dtype(out_dtype).itemsize)
    bytes_per_row = W * itemsize
    vmem_budget = max(4 * 1024 * 1024, vmem_limit_bytes - _VMEM_HEADROOM)

    # Double-buffered input block + double-buffered output block = 4 * tile.
    tm_vmem = max(row_align,
                  _round_down(vmem_budget // (4 * bytes_per_row), row_align))
    # Force >= _MIN_GRID_STEPS pipelined steps when there is enough data so
    # read/write DMAs overlap and v7x can split rows across both TensorCores.
    rows_for_steps = _round_up(_cdiv(rows, _MIN_GRID_STEPS), row_align)
    rows_floor = _round_up(_cdiv(_MIN_STEP_BYTES, bytes_per_row), row_align)
    tm_eff = min(tm, tm_vmem, max(rows_for_steps, rows_floor))
    tm_eff = max(row_align, _round_down(tm_eff, row_align))
    if tm_eff >= rows:
        tm_eff = rows  # only for tiny inputs: single full-extent block (legal)

    grid = (_cdiv(rows, tm_eff),)
    total = rows * W
    cost = pl.CostEstimate(
        flops=total,
        transcendentals=0,
        bytes_accessed=total * (jnp.dtype(x2.dtype).itemsize
                                + jnp.dtype(out_dtype).itemsize),
    )
    extra = {}
    if donate_input and x2.dtype == jnp.dtype(out_dtype):
        extra["input_output_aliases"] = {0: 0}

    return pl.pallas_call(
        _layer_scale_kernel,
        out_shape=jax.ShapeDtypeStruct((rows, W), out_dtype),
        grid_spec=pltpu.PrefetchScalarGridSpec(
            num_scalar_prefetch=0,
            grid=grid,
            in_specs=[
                pl.BlockSpec((tm_eff, W), lambda i: (i, 0)),   # x row tile
                pl.BlockSpec((1, W), lambda i: (0, 0)),        # gamma, resident
            ],
            out_specs=pl.BlockSpec((tm_eff, W), lambda i: (i, 0)),
        ),
        compiler_params=pltpu.CompilerParams(
            dimension_semantics=("parallel",),          # megacore split on v7x
            vmem_limit_bytes=vmem_limit_bytes,
        ),
        cost_estimate=cost,
        **extra,
    )(x2, gamma_row)


def layer_scale(x, gamma, *, tm=4096, vmem_limit_bytes=None, donate_input=False):
    """LayerScale forward: x * gamma, gamma (D,) broadcast over x (..., D)."""
    orig_shape = x.shape
    D = orig_shape[-1]
    assert gamma.shape == (D,), "gamma must have shape (dim,)"
    M = 1
    for s in orig_shape[:-1]:
        M *= s

    out_dtype = jnp.result_type(x.dtype, gamma.dtype)   # torch-style promotion
    gamma = gamma.astype(out_dtype)

    if M * D == 0:
        return (x.reshape(M, D) * gamma).reshape(orig_shape)

    if vmem_limit_bytes is None:
        vmem_limit_bytes = _default_vmem_limit_bytes()
    row_align = max(_sublane_align(x.dtype), _sublane_align(out_dtype))
    itemsize = max(jnp.dtype(x.dtype).itemsize, jnp.dtype(out_dtype).itemsize)
    vmem_budget = max(4 * 1024 * 1024, vmem_limit_bytes - _VMEM_HEADROOM)

    # Lane packing factor: smallest k with (k*D) % 128 == 0.
    base_k = 128 // math.gcd(D, 128)
    if base_k > 1 and 4 * row_align * base_k * D * itemsize > vmem_budget:
        base_k = 1   # pathologically wide packed row would not fit VMEM

    x_flat = x.reshape(M, D)
    m_rem = M % base_k
    if m_rem != 0 and D >= 128:
        # Row already spans >= one full lane group; mild lane padding is cheaper
        # than the extra concat pass a prefix/remainder split would need.
        base_k, m_rem = 1, 0

    m_main = M - m_rem
    k = base_k
    W = k * D
    rows = m_main // k

    if rows == 0:
        return (x_flat * gamma).reshape(orig_shape)      # tiny: plain JAX

    gamma_row = jnp.tile(gamma, k).reshape(1, W)          # tiled ONCE, resident
    x_main = x_flat if m_rem == 0 else x_flat[:m_main]
    x2 = x_main.reshape(rows, W)                          # row-major, free

    out_main = _layer_scale_2d(
        x2, gamma_row, tm=tm, row_align=row_align,
        vmem_limit_bytes=vmem_limit_bytes, out_dtype=out_dtype,
        donate_input=donate_input)

    if m_rem == 0:
        return out_main.reshape(orig_shape)

    # Tiny remainder (< base_k rows, only when D < 128): plain JAX + concat.
    out_rem = x_flat[m_main:] * gamma
    out = jnp.concatenate([out_main.reshape(m_main, D), out_rem], axis=0)
    return out.reshape(orig_shape)


if __name__ == "__main__":
    # Module config: dim = 32, init_values = 1e-5 (deterministic init as in __init__).
    B, N, D = 2, 8, 32
    init_values = 1e-5

    key = jax.random.PRNGKey(0)
    x = jax.random.normal(key, (B, N, D), dtype=jnp.float32)
    gamma = init_values * jnp.ones((D,), dtype=jnp.float32)

    out = layer_scale(x, gamma)
    jax.block_until_ready(out)

    # Correctness check against plain-JAX reference (same as PyTorch x * gamma).
    ref = x * gamma
    assert out.shape == ref.shape and out.dtype == ref.dtype
    assert jnp.allclose(out, ref, atol=1e-6, rtol=1e-6), "mismatch vs reference"

    print("KERNEL_OK")
</pallas_src>

<mosaic_0001>
module attributes {stable_mosaic.version = 11 : i64} {
  func.func @_layer_scale_kernel(%arg0: i32, %arg1: memref<4x128xf32, #tpu.memory_space<vmem>>, %arg2: memref<1x128xf32, #tpu.memory_space<vmem>>, %arg3: memref<4x128xf32, #tpu.memory_space<vmem>>) attributes {dimension_semantics = [#tpu.dimension_semantics<parallel>], iteration_bounds = array<i64: 1>, scalar_prefetch = 0 : i64, scratch_operands = 0 : i64, tpu.core_type = #tpu.core_type<tc>, window_params = [{transform_indices = @transform_0, window_bounds = array<i64: 4, 128>}, {pipeline_mode = #tpu.pipeline_mode<synchronous>, transform_indices = @transform_1, window_bounds = array<i64: 1, 128>}, {transform_indices = @transform_2, window_bounds = array<i64: 4, 128>}]} {
    %c0 = arith.constant 0 : index
    %c0_0 = arith.constant 0 : index
    %0 = vector.load %arg1[%c0, %c0_0] : memref<4x128xf32, #tpu.memory_space<vmem>>, vector<4x128xf32>
    %c0_1 = arith.constant 0 : index
    %c0_2 = arith.constant 0 : index
    %1 = vector.load %arg2[%c0_1, %c0_2] : memref<1x128xf32, #tpu.memory_space<vmem>>, vector<1x128xf32>
    %2 = vector.broadcast %1 : vector<1x128xf32> to vector<4x128xf32>
    %3 = arith.mulf %0, %2 : vector<4x128xf32>
    %c0_3 = arith.constant 0 : index
    %c0_4 = arith.constant 0 : index
    %4 = vector.load %arg3[%c0_3, %c0_4] : memref<4x128xf32, #tpu.memory_space<vmem>>, vector<4x128xf32>
    tpu.vector_store %arg3[%c0_3, %c0_4], %3 {strides = array<i32>} : memref<4x128xf32, #tpu.memory_space<vmem>>, vector<4x128xf32>,
    return
  }
  func.func @transform_0(%arg0: i32) -> (i32, i32) {
    %c0_i32 = arith.constant 0 : i32
    %c0_i32_0 = arith.constant 0 : i32
    return %arg0, %c0_i32 : i32, i32
  }
  func.func @transform_1(%arg0: i32) -> (i32, i32) {
    %c0_i32 = arith.constant 0 : i32
    %c0_i32_0 = arith.constant 0 : i32
    %c0_i32_1 = arith.constant 0 : i32
    return %c0_i32, %c0_i32_0 : i32, i32
  }
  func.func @transform_2(%arg0: i32) -> (i32, i32) {
    %c0_i32 = arith.constant 0 : i32
    %c0_i32_0 = arith.constant 0 : i32
    return %arg0, %c0_i32 : i32, i32
  }
}

</mosaic_0001>

<bundles_post_ra>
// kernel: tpu_custom_call.1
= control target key start
LH: loop header
LB: loop body
LE: loop exit
PB: predicated region body
PF: predicated region fallthrough
CT: control target
= control target key end

     0   :  { %7 = vsyncpa [#allocation3], 0  ;;  %s144_s0 = inlined_call_operand.hbm [shape: f32[4,128], index: 0, kind: input, shape index: {}]   ;;  %s145_s1 = inlined_call_operand.vmem [shape: f32[1,128], index: 1, kind: input, shape index: {}]   ;;  %s146_s2 = inlined_call_operand.hbm [shape: f32[4,128], index: 2, kind: output, shape index: {}]  }
   0x1   :  { %8 = vsyncpa [#allocation4], 0  ;;  %s100_s9 = smov [#allocation2]   ;;  %s52_s13 = scalar_lea.hbm %s144_s0, 64 }
   0x2   :  { %s15_s10 = sshll.u32 %s100_s9, 4  ;;  %p53_p0 = scmp.ne.s32.totalorder %s144_s0, %s52_s13  ;;  %s16_s10 = int_to_ptr.vmem [resolvable:$true] %s15_s10 }
   0x3   :  { %p56_p1 = scmp.lt.u32.totalorder %s52_s13, %s144_s0 }
   0x5   :  { %p58_p2 = pnand %p56_p1, %p53_p0 }
   0x7   :  { %61 = shalt.err (!%p58_p2)
}
   0x8   :  { %s62_s18 = scalar_lea.vmem %s16_s10, 64  ;;  %p67_p4 = scmp.lt.s32.totalorder %s16_s10, %s16_s10 }
   0x9   :  { %p63_p3 = scmp.ne.s32.totalorder %s16_s10, %s62_s18  ;;  %p68_p5 = scmp.lt.s32.totalorder %s62_s18, %s62_s18 }
   0xb   :  { %p69_p6 = por %p68_p5, %p67_p4 }
   0xd   :  { %p70_p7 = pnand %p69_p6, %p63_p3 }
   0xf   :  { %73 = shalt.err (!%p70_p7)
}
  0x10   :  { %18 = dma.hbm_to_vmem [thread:$0]  %s144_s0, 64, %s16_s10, [#allocation3]  }
  0x11   :  { %96 = dma.done.wait [#allocation3], 64  }
  0x12   :  { %97 = vsyncadd [#allocation3], 4294967232  ;;  %s101_s21 = smov [#allocation5]   ;;  %v24_v0 = vld [vmem:[#allocation2] sm:$0xf] }
  0x13   :  { %s40_s22 = sshll.u32 %s101_s21, 4  ;;  %v49_v1 = vld [vmem:[%s145_s1] ss:$0 sm:$0xff]  ;;  %s41_s22 = int_to_ptr.vmem [resolvable:$true] %s40_s22 }
  0x14   :  { %v32_v2 = vmul.f32 %v49_v1, %v24_v0  ;;  %s74_s25 = scalar_lea.vmem %s41_s22, 64  ;;  %p79_p9 = scmp.lt.s32.totalorder %s41_s22, %s41_s22 }
  0x15   :  { %p75_p8 = scmp.ne.s32.totalorder %s41_s22, %s74_s25  ;;  %p80_p10 = scmp.lt.s32.totalorder %s74_s25, %s74_s25 }
  0x16   :  { %33 = vst [vmem:[#allocation5] sm:$0xf] %v32_v2 }
  0x17   :  { %p81_p11 = por %p80_p10, %p79_p9 }
  0x19   :  { %p82_p12 = pnand %p81_p11, %p75_p8 }
  0x1b   :  { %85 = shalt.err (!%p82_p12)
}
  0x1c   :  { %s86_s27 = scalar_lea.hbm %s146_s2, 64 }
  0x1d   :  { %p87_p13 = scmp.ne.s32.totalorder %s146_s2, %s86_s27  ;;  %p90_p0 = scmp.lt.u32.totalorder %s86_s27, %s146_s2 }
  0x1f   :  { %p92_p1 = pnand %p90_p0, %p87_p13 }
  0x21   :  { %95 = shalt.err (!%p92_p1)
}
  0x22   :  { %43 = dma.vmem_to_hbm [thread:$0]  %s41_s22, 64, %s146_s2, [#allocation4]  }
  0x23   :  { %98 = dma.done.wait [#allocation4], 64  }
  0x24   :  { %99 = vsyncadd [#allocation4], 4294967232 }
  0x25   :  { %47 = vsyncpa [#allocation3], 1 }
  0x26   :  { %48 = vsyncpa [#allocation4], 1 }

</bundles_post_ra>
